<compile_context>
chip_gen: v7x
topology: tpu7x:2x2x1
jax: 0.10.0
libtpu: 0.0.40
codegen_flags: <defaults>
</compile_context>

<pallas_src>
import functools

import jax
import jax.numpy as jnp
import numpy as np
from jax.experimental import pallas as pl
from jax.experimental.pallas import tpu as pltpu

_TARGET_BLOCK_BYTES = 6 << 20      # ~6 MiB content block (review: v6e/v7x sweet spot)
_VMEM_BUDGET_BYTES = 48 << 20      # safe on v5e/v6e (128 MiB phys) and v7x (64 MiB/TC)


def _make_adain_kernel(hw: int):
    """Kernel body; hw is static (trace-time)."""
    inv_n = 1.0 / float(hw)
    inv_nm1 = 1.0 / float(hw - 1) if hw > 1 else float("nan")  # ddof=1 (torch.std)

    def kernel(c_ref, stats_ref, out_ref):
        # c_ref: (row_tile, HW)   stats_ref: (row_tile, 2)   out_ref: (row_tile, HW)
        c = c_ref[...].astype(jnp.float32)

        # Two-pass variance (kept for numerical parity with torch; review's
        # one-pass E[x^2]-mean^2 variant is less stable when |mean| >> std).
        mean_c = jnp.sum(c, axis=1, keepdims=True) * jnp.float32(inv_n)
        dc = c - mean_c
        var_c = jnp.sum(dc * dc, axis=1, keepdims=True) * jnp.float32(inv_nm1)

        # EUP rsqrt instead of sqrt + divide; fold into a per-row affine.
        inv_std_c = jax.lax.rsqrt(var_c)                     # (rows, 1)
        stats = stats_ref[...].astype(jnp.float32)           # (rows, 2)
        mean_s = stats[:, 0:1]
        std_s = stats[:, 1:2]
        scale = std_s * inv_std_c                            # (rows, 1)

        out_ref[...] = (dc * scale + mean_s).astype(out_ref.dtype)

    return kernel


def _pick_row_tile(R: int, HW: int, itemsize: int,
                   target_bytes: int = _TARGET_BLOCK_BYTES) -> int:
    """Rows per block: multiple of 8 (or == R), divides R, block <= ~target.

    Prefers a divisor that yields an even grid count (balances v7x's 2 TCs
    under dimension_semantics=('parallel',)).  If everything fits in one
    block, uses grid=(1,) — forcing extra steps on single-TC chips is pure
    sequential-loop overhead.
    """
    if R <= 8 or R % 8 != 0:
        return R                                   # full-extent block is always legal
    bytes_per_row = max(HW * itemsize, 1)
    rows_fit = (target_bytes // bytes_per_row) // 8 * 8
    rows_fit = max(8, min(R, rows_fit))
    if rows_fit >= R:
        return R
    best_any = None
    t = rows_fit
    while t >= 8:
        if R % t == 0:
            if (R // t) % 2 == 0:
                return t                           # even grid: megacore-balanced
            if best_any is None:
                best_any = t
        t -= 8
    return best_any if best_any is not None else R


def _vmem_plan(row_tile: int, HW: int, itemsize: int):
    """Return (vmem_limit_bytes, buffer_count) for the content/output specs."""
    block_bytes = row_tile * HW * itemsize          # one DMA buffer (in or out)
    block_f32 = row_tile * HW * 4                   # spilled f32 temporaries (dc, etc.)
    slack = 1 << 20
    est_double = 4 * block_bytes + 2 * block_f32 + slack   # double-buffered in+out
    if est_double <= _VMEM_BUDGET_BYTES:
        return max(32 << 20, est_double), 2
    # Very large spatial sizes (>= ~512x512 at the 8-row minimum): drop to
    # single buffering instead of blowing the scoped VMEM limit.
    est_single = 2 * block_bytes + 2 * block_f32 + slack
    return min(_VMEM_BUDGET_BYTES, max(32 << 20, est_single)), 1


@functools.partial(jax.jit, static_argnames=("row_tile",))
def adain(content, style, *, row_tile=None):
    """content: (N, C, H, W); style: (N, C, S) -> (N, C, H, W)."""
    N, C, H, W = content.shape
    assert style.shape[:2] == (N, C), "content/style batch & channel dims must match"
    R = N * C
    HW = H * W
    itemsize = jnp.dtype(content.dtype).itemsize

    # No lane padding: BlockSpec last dim == full array extent (legal for any HW).
    c2d = content.reshape(R, HW)

    # Style statistics hoisted out of the hot loop (tiny (R, S) arrays) and
    # packed into a single (R, 2) input -> one small DMA per grid step.
    style_f32 = style.astype(jnp.float32)
    mean_s = jnp.mean(style_f32, axis=2)
    std_s = jnp.std(style_f32, axis=2, ddof=1)
    stats = jnp.stack([mean_s, std_s], axis=-1).reshape(R, 2)

    if row_tile is None:
        row_tile = _pick_row_tile(R, HW, itemsize)
    assert R % row_tile == 0, "row_tile must divide N*C"

    vmem_limit, buffers = _vmem_plan(row_tile, HW, itemsize)
    big_pipeline = None if buffers == 2 else pl.Buffered(1)

    cost = pl.CostEstimate(
        flops=6 * R * HW,
        transcendentals=R,
        bytes_accessed=2 * R * HW * itemsize + R * 2 * 4,
    )

    out2d = pl.pallas_call(
        _make_adain_kernel(HW),
        out_shape=jax.ShapeDtypeStruct((R, HW), content.dtype),
        grid_spec=pltpu.PrefetchScalarGridSpec(
            num_scalar_prefetch=0,
            grid=(R // row_tile,),
            in_specs=[
                pl.BlockSpec((row_tile, HW), lambda i: (i, 0),
                             pipeline_mode=big_pipeline),
                pl.BlockSpec((row_tile, 2), lambda i: (i, 0)),
            ],
            out_specs=pl.BlockSpec((row_tile, HW), lambda i: (i, 0),
                                   pipeline_mode=big_pipeline),
        ),
        compiler_params=pltpu.CompilerParams(
            dimension_semantics=("parallel",),
            vmem_limit_bytes=int(vmem_limit),
        ),
        cost_estimate=cost,
    )(c2d, stats)

    return out2d.reshape(N, C, H, W)


def _adain_ref(content, style):
    # pure-JAX reference mirroring the PyTorch module (unbiased std)
    mean_style = jnp.mean(style, axis=2)
    std_style = jnp.std(style, axis=2, ddof=1)
    mean_content = jnp.mean(content, axis=(2, 3))
    std_content = jnp.std(content, axis=(2, 3), ddof=1)
    norm = (content - mean_content[:, :, None, None]) / std_content[:, :, None, None]
    return norm * std_style[:, :, None, None] + mean_style[:, :, None, None]


if __name__ == "__main__":
    key = jax.random.PRNGKey(0)
    k1, k2 = jax.random.split(key)

    N, C, H, W = 2, 4, 16, 16
    S = 8
    content = jax.random.normal(k1, (N, C, H, W), dtype=jnp.float32) * 2.0 + 0.5
    style = jax.random.normal(k2, (N, C, S), dtype=jnp.float32) * 3.0 - 1.0

    out = adain(content, style)
    out = jax.block_until_ready(out)

    ref = _adain_ref(content, style)
    np.testing.assert_allclose(np.asarray(out), np.asarray(ref), rtol=2e-5, atol=2e-5)

    print("KERNEL_OK")
</pallas_src>

<mosaic_0001>
module attributes {stable_mosaic.version = 11 : i64} {
  func.func @kernel(%arg0: i32, %arg1: memref<8x256xf32, #tpu.memory_space<vmem>>, %arg2: memref<8x2xf32, #tpu.memory_space<vmem>>, %arg3: memref<8x256xf32, #tpu.memory_space<vmem>>) attributes {dimension_semantics = [#tpu.dimension_semantics<parallel>], iteration_bounds = array<i64: 1>, scalar_prefetch = 0 : i64, scratch_operands = 0 : i64, tpu.core_type = #tpu.core_type<tc>, window_params = [{transform_indices = @transform_0, window_bounds = array<i64: 8, 256>}, {transform_indices = @transform_1, window_bounds = array<i64: 8, 2>}, {transform_indices = @transform_2, window_bounds = array<i64: 8, 256>}]} {
    %c0 = arith.constant 0 : index
    %c0_0 = arith.constant 0 : index
    %0 = vector.load %arg1[%c0, %c0_0] : memref<8x256xf32, #tpu.memory_space<vmem>>, vector<8x256xf32>
    %cst = arith.constant dense<0.000000e+00> : vector<8xf32>
    %1 = vector.multi_reduction <add>, %0, %cst [1] : vector<8x256xf32> to vector<8xf32>
    %2 = vector.shape_cast %1 : vector<8xf32> to vector<8x1xf32>
    %cst_1 = arith.constant 3.906250e-03 : f32
    %3 = vector.broadcast %cst_1 : f32 to vector<8x1xf32>
    %4 = arith.mulf %2, %3 : vector<8x1xf32>
    %5 = vector.broadcast %4 : vector<8x1xf32> to vector<8x256xf32>
    %6 = arith.subf %0, %5 : vector<8x256xf32>
    %7 = arith.mulf %6, %6 : vector<8x256xf32>
    %cst_2 = arith.constant dense<0.000000e+00> : vector<8xf32>
    %8 = vector.multi_reduction <add>, %7, %cst_2 [1] : vector<8x256xf32> to vector<8xf32>
    %9 = vector.shape_cast %8 : vector<8xf32> to vector<8x1xf32>
    %cst_3 = arith.constant 0.00392156886 : f32
    %10 = vector.broadcast %cst_3 : f32 to vector<8x1xf32>
    %11 = arith.mulf %9, %10 : vector<8x1xf32>
    %12 = math.rsqrt %11 : vector<8x1xf32>
    %c0_4 = arith.constant 0 : index
    %c0_5 = arith.constant 0 : index
    %13 = vector.load %arg2[%c0_4, %c0_5] : memref<8x2xf32, #tpu.memory_space<vmem>>, vector<8x2xf32>
    %14 = vector.extract_strided_slice %13 {offsets = [0, 0], sizes = [8, 1], strides = [1, 1]} : vector<8x2xf32> to vector<8x1xf32>
    %15 = vector.extract_strided_slice %13 {offsets = [0, 1], sizes = [8, 1], strides = [1, 1]} : vector<8x2xf32> to vector<8x1xf32>
    %16 = arith.mulf %15, %12 : vector<8x1xf32>
    %17 = vector.broadcast %16 : vector<8x1xf32> to vector<8x256xf32>
    %18 = arith.mulf %6, %17 : vector<8x256xf32>
    %19 = vector.broadcast %14 : vector<8x1xf32> to vector<8x256xf32>
    %20 = arith.addf %18, %19 : vector<8x256xf32>
    %c0_6 = arith.constant 0 : index
    %c0_7 = arith.constant 0 : index
    %21 = vector.load %arg3[%c0_6, %c0_7] : memref<8x256xf32, #tpu.memory_space<vmem>>, vector<8x256xf32>
    tpu.vector_store %arg3[%c0_6, %c0_7], %20 {strides = array<i32>} : memref<8x256xf32, #tpu.memory_space<vmem>>, vector<8x256xf32>,
    return
  }
  func.func @transform_0(%arg0: i32) -> (i32, i32) {
    %c0_i32 = arith.constant 0 : i32
    %c0_i32_0 = arith.constant 0 : i32
    return %arg0, %c0_i32 : i32, i32
  }
  func.func @transform_1(%arg0: i32) -> (i32, i32) {
    %c0_i32 = arith.constant 0 : i32
    %c0_i32_0 = arith.constant 0 : i32
    return %arg0, %c0_i32 : i32, i32
  }
  func.func @transform_2(%arg0: i32) -> (i32, i32) {
    %c0_i32 = arith.constant 0 : i32
    %c0_i32_0 = arith.constant 0 : i32
    return %arg0, %c0_i32 : i32, i32
  }
}

</mosaic_0001>

<bundles_post_ra>
// kernel: adain.1
= control target key start
LH: loop header
LB: loop body
LE: loop exit
PB: predicated region body
PF: predicated region fallthrough
CT: control target
= control target key end

     0   :  { %v55_v10 = vmov 1   ;;  %v56_v11 = vmov 0   ;;  %s87_s0 = inlined_call_operand.vmem [shape: f32[8,256], index: 0, kind: input, shape index: {}]   ;;  %s88_s1 = inlined_call_operand.vmem [shape: f32[8,2], index: 1, kind: input, shape index: {}]   ;;  %s89_s2 = inlined_call_operand.vmem [shape: f32[8,256], index: 2, kind: output, shape index: {}]  }
   0x1   :  { %v11_v0 = vld [vmem:[%s87_s0] sm:$0xff]  ;;  %v12_v1 = vld [vmem:[%s87_s0 + $0x8] sm:$0xff]  ;;  %50 = vset.pattern.permute.xlu1 %v55_v10  ;;  %52 = vset.pattern.permute.xlu0 %v56_v11 }
   0x2   :  { %v13_v2 = vadd.f32 %v12_v1, %v11_v0  ;;  %v26_v14 = vld [vmem:[%s88_s1] sm:$0xff] }
   0x4   :  { %14 = vadd.xlane.f32.xlu0 %v13_v2 }
  0x91   :  { %v15_v3 = vpop.xlane.xlu0 %14 }
  0x92   :  { %v16_v4 = vmul.f32 0.00390625, %v15_v3 }
  0x94   :  { %v17_v5 = vsub.f32 %v11_v0, %v16_v4  ;;  %v18_v6 = vsub.f32 %v12_v1, %v16_v4 }
  0x96   :  { %v19_v7 = vmul.f32 %v17_v5, %v17_v5  ;;  %v20_v8 = vmul.f32 %v18_v6, %v18_v6 }
  0x98   :  { %v21_v9 = vadd.f32 %v20_v8, %v19_v7 }
  0x9a   :  { %22 = vadd.xlane.f32.xlu0 %v21_v9 }
 0x127   :  { %v23_v12 = vpop.xlane.xlu0 %22 }
 0x128   :  { %v24_v13 = vmul.f32 0.003921569, %v23_v12 }
 0x12a   :  { %53 = vrsqrt.f32 %v24_v13 }
 0x134   :  { %v54_v15 = vpop.eup %53 }
 0x135   :  { %v27_v16 = vmul.f32 %v54_v15, %v26_v14 }
 0x137   :  { %30 = vperm.xlu1 %50, %v27_v16  }
 0x13b   :  { %51 = vset.pattern.permute.xlu1 %v56_v11 }
 0x13c   :  { %37 = vperm.xlu1 %51, %v26_v14  }
 0x1b6   :  { %v31_v17 = vpop.permute.xlu1 %30 }
 0x1b7   :  { %v33_v18 = vmul.f32 %v31_v17, %v17_v5  ;;  %v34_v19 = vmul.f32 %v31_v17, %v18_v6 }
 0x1bb   :  { %v38_v20 = vpop.permute.xlu1 %37 }
 0x1bc   :  { %v40_v21 = vadd.f32 %v38_v20, %v33_v18  ;;  %v41_v22 = vadd.f32 %v38_v20, %v34_v19 }
 0x1be   :  { %42 = vst [vmem:[%s89_s2] sm:$0xff] %v40_v21  ;;  %43 = vst [vmem:[%s89_s2 + $0x8] sm:$0xff] %v41_v22 }

</bundles_post_ra>
